<compile_context>
chip_gen: v7x
topology: tpu7x:2x2x1
jax: 0.10.0
libtpu: 0.0.40
codegen_flags: <defaults>
</compile_context>

<pallas_src>
import functools
import math

import jax
import jax.numpy as jnp
import numpy as np
from jax.experimental import pallas as pl
from jax.experimental.pallas import tpu as pltpu


def _phase_conv_kernel(x_ref, w_ref, b_ref, *refs, groups, cin, cout):
    """One batch element: all s*s output phases of the transposed convolution.

    x_ref : (Cin, Lflat)        bf16  flat zero-padded input image (row stride Wpad)
    w_ref : (Cout, total_cols)  bf16  per-phase tap weights, column-stacked
    b_ref : (Cout, 1)           f32
    refs  : per-phase outputs (Cout, Th*Wpad) f32 ..., then one VMEM scratch
    """
    o_refs, scr = refs[:-1], refs[-1]
    bias = b_ref[...]                                          # (Cout, 1) f32

    for g, grp in enumerate(groups):                           # static unroll (<= s*s)
        nflat = grp["nflat"]
        if grp["ncols"] == 0:                                  # stride > K corner case
            o_refs[g][...] = jnp.zeros((cout, nflat), jnp.float32) + bias
            continue
        # Stack this phase's Mh*Mw taps into the scratch -> one deep-contraction
        # matmul instead of Mh*Mw tiny Cin-deep ones.
        for t, off in enumerate(grp["offs"]):                  # static offsets
            scr[t * cin:(t + 1) * cin, :nflat] = x_ref[:, off:off + nflat]
        acc = jnp.dot(w_ref[:, grp["col0"]:grp["col0"] + grp["ncols"]],
                      scr[:grp["ncols"], :nflat],
                      preferred_element_type=jnp.float32)      # (Cout, nflat) f32
        o_refs[g][...] = acc + bias                            # single lane-dense store


def equal_conv_transpose2d(x_nchw, weight, bias, *, stride=1, padding=0):
    """Matches F.conv_transpose2d(x, weight * scale, bias, stride, padding)."""
    N, Cin, H, W = x_nchw.shape
    Cin_w, Cout, K, K2 = weight.shape
    assert Cin == Cin_w and K == K2
    s = int(stride)
    p = int(padding)
    assert s >= 1 and 0 <= p <= K - 1, "requires stride >= 1 and 0 <= padding <= K-1"
    # TODO(synk): output_padding is not part of the module and is not supported.
    scale = 1.0 / math.sqrt(Cin * K * K)

    Ho = (H - 1) * s - 2 * p + K
    Wo = (W - 1) * s - 2 * p + K
    assert Ho >= s and Wo >= s

    # ---- static sub-pixel phase bookkeeping --------------------------------
    # Output pixel oh with (oh + p) % s == ph reads input rows ih = t - m where
    # t = (oh + p) // s and kernel rows kh = ph + s*m (no explicit weight flip).
    def phase(ph, size):
        m = max(0, -(-(K - ph) // s))          # ceil((K - ph)/s): taps in this phase
        t_min = -((ph - p) // s)               # ceil((p - ph)/s)  (>= 0)
        t_max = ((size - 1) * s + K - 1 - p - ph) // s
        return m, t_min, t_max

    hph = [phase(ph, H) for ph in range(s)]
    wph = [phase(pw, W) for pw in range(s)]
    PT = max([0] + [m - 1 - tmin for m, tmin, _ in hph])
    PB = max([0] + [tmax - (H - 1) for _, _, tmax in hph])
    PL = max([0] + [m - 1 - tmin for m, tmin, _ in wph])
    PR = max([0] + [tmax - (W - 1) for _, _, tmax in wph])
    Hpad, Wpad = H + PT + PB, W + PL + PR

    groups, w_cols, col0 = [], [], 0
    for ph in range(s):
        Mh, th_min, th_max = hph[ph]
        Th = th_max - th_min + 1
        oh0 = s * th_min + ph - p              # first output row of this phase
        for pw in range(s):
            Mw, tw_min, tw_max = wph[pw]
            Tw = tw_max - tw_min + 1
            ow0 = s * tw_min + pw - p
            offs = []
            for mh in range(Mh):
                for mw in range(Mw):
                    r0 = PT + th_min - mh
                    c0 = PL + tw_min - mw
                    offs.append(r0 * Wpad + c0)
                    # (Cout, Cin) tap, kernel element (ph + s*mh, pw + s*mw)
                    w_cols.append(jnp.transpose(weight[:, :, ph + s * mh, pw + s * mw]))
            ncols = Mh * Mw * Cin
            groups.append(dict(offs=tuple(offs), nflat=Th * Wpad, ncols=ncols,
                               col0=col0, Th=Th, Tw=Tw, oh0=oh0, ow0=ow0))
            col0 += ncols
    total_cols = col0                          # == K*K*Cin when s <= K

    # ---- glue: flat padded activation, stacked tap weights, bias -----------
    xpd = jnp.pad(x_nchw, ((0, 0), (0, 0), (PT, PB), (PL, PR)))
    xf = xpd.reshape(N, Cin, Hpad * Wpad).astype(jnp.bfloat16)
    l_need = max([Hpad * Wpad]
                 + [max(g["offs"]) + g["nflat"] for g in groups if g["offs"]])
    Lflat = ((l_need + 127) // 128) * 128
    xf = jnp.pad(xf, ((0, 0), (0, 0), (0, Lflat - Hpad * Wpad)))

    w_mat = (jnp.concatenate(w_cols, axis=1) * scale).astype(jnp.bfloat16)  # (Cout, total_cols)

    if bias is None:
        bias = jnp.zeros((Cout,), jnp.float32)
    b2 = bias.reshape(Cout, 1).astype(jnp.float32)

    max_nflat = max(g["nflat"] for g in groups)
    max_rows = max(g["ncols"] for g in groups)

    flops = 2 * N * sum(Cout * g["ncols"] * g["nflat"] for g in groups)
    bytes_accessed = (xf.size * 2 + w_mat.size * 2 + b2.size * 4
                      + sum(N * Cout * g["nflat"] * 4 for g in groups))

    kernel = functools.partial(_phase_conv_kernel, groups=tuple(groups),
                               cin=Cin, cout=Cout)

    outs = pl.pallas_call(
        kernel,
        out_shape=[jax.ShapeDtypeStruct((N, Cout, g["nflat"]), jnp.float32)
                   for g in groups],
        grid=(N,),
        in_specs=[
            # Whole flat padded image of one batch element, loaded once.
            # TODO(synk): for very large images (v7x 64 MiB VMEM) switch to a
            # row-tiled window with a ceil((K-1)/s)-row halo instead.
            pl.BlockSpec((None, Cin, Lflat), lambda n: (n, 0, 0)),
            pl.BlockSpec((Cout, total_cols), lambda n: (0, 0)),
            pl.BlockSpec((Cout, 1), lambda n: (0, 0)),
        ],
        out_specs=[pl.BlockSpec((None, Cout, g["nflat"]), lambda n: (n, 0, 0))
                   for g in groups],
        scratch_shapes=[pltpu.VMEM((max_rows, max_nflat), jnp.bfloat16)],
        compiler_params=pltpu.CompilerParams(
            dimension_semantics=("parallel",),
            vmem_limit_bytes=32 * 1024 * 1024),
        cost_estimate=pl.CostEstimate(flops=flops, transcendentals=0,
                                      bytes_accessed=bytes_accessed),
    )(xf, w_mat, b2)

    # ---- interleave the s*s phase grids back into NCHW ---------------------
    # TODO(synk): at very large shapes replace this strided scatter with a
    # stack+transpose+reshape interleave to avoid the extra output pass.
    y = jnp.zeros((N, Cout, Ho, Wo), jnp.float32)
    for grp, og in zip(groups, outs):
        blk = og.reshape(N, Cout, grp["Th"], Wpad)[:, :, :, :grp["Tw"]]
        y = y.at[:, :, grp["oh0"]::s, grp["ow0"]::s].set(blk)
    return y


def _reference(x_nchw, weight, bias, *, stride, padding):
    """Pure-JAX reference for F.conv_transpose2d(x, weight*scale, bias, ...)."""
    Cin, Cout, K, _ = weight.shape
    scale = 1.0 / math.sqrt(Cin * K * K)
    rhs = jnp.transpose(weight, (1, 0, 2, 3))[:, :, ::-1, ::-1] * scale  # OIHW
    pad = K - 1 - padding
    y = jax.lax.conv_general_dilated(
        x_nchw, rhs,
        window_strides=(1, 1),
        padding=[(pad, pad), (pad, pad)],
        lhs_dilation=(stride, stride),
        dimension_numbers=("NCHW", "OIHW", "NCHW"))
    if bias is not None:
        y = y + bias[None, :, None, None]
    return y


def _check(x, weight, bias, *, stride, padding):
    out = jax.block_until_ready(
        equal_conv_transpose2d(x, weight, bias, stride=stride, padding=padding))
    ref = jax.block_until_ready(
        _reference(x, weight, bias, stride=stride, padding=padding))
    N, Cin, H, W = x.shape
    K = weight.shape[2]
    Cout = weight.shape[1]
    expected = (N, Cout, (H - 1) * stride - 2 * padding + K,
                (W - 1) * stride - 2 * padding + K)
    assert out.shape == expected, (out.shape, expected)
    err = float(np.max(np.abs(np.asarray(out) - np.asarray(ref))))
    # bf16 activations/weights with f32 accumulation -> loosened tolerance.
    assert np.allclose(np.asarray(out), np.asarray(ref), atol=5e-2, rtol=5e-2), err


if __name__ == "__main__":
    key = jax.random.PRNGKey(0)
    kx, kw, kb, kx2, kw2 = jax.random.split(key, 5)

    # Shapes consistent with the module: batch=2, Cin=4, Cout=8, 16x16, K=3.
    N, Cin, Cout, H, W, K = 2, 4, 8, 16, 16, 3
    x = jax.random.normal(kx, (N, Cin, H, W), dtype=jnp.float32)
    weight = jax.random.normal(kw, (Cin, Cout, K, K), dtype=jnp.float32)  # torch.randn
    bias = 0.1 * jax.random.normal(kb, (Cout,), dtype=jnp.float32)
    _check(x, weight, bias, stride=2, padding=1)

    # Also exercise stride=1 / padding=0 / bias=None path (single phase).
    x2 = jax.random.normal(kx2, (1, Cin, 8, 8), dtype=jnp.float32)
    weight2 = jax.random.normal(kw2, (Cin, Cout, K, K), dtype=jnp.float32)
    _check(x2, weight2, None, stride=1, padding=0)

    print("KERNEL_OK")
</pallas_src>

<mosaic_0001>
module attributes {stable_mosaic.version = 11 : i64} {
  func.func @_phase_conv_kernel(%arg0: i32, %arg1: memref<1x4x384xbf16, #tpu.memory_space<vmem>>, %arg2: memref<8x36xbf16, #tpu.memory_space<vmem>>, %arg3: memref<8x1xf32, #tpu.memory_space<vmem>>, %arg4: memref<1x8x240xf32, #tpu.memory_space<vmem>>, %arg5: memref<1x8x240xf32, #tpu.memory_space<vmem>>, %arg6: memref<1x8x256xf32, #tpu.memory_space<vmem>>, %arg7: memref<1x8x256xf32, #tpu.memory_space<vmem>>, %arg8: memref<16x256xbf16, #tpu.memory_space<vmem>>) attributes {dimension_semantics = [#tpu.dimension_semantics<parallel>], iteration_bounds = array<i64: 2>, scalar_prefetch = 0 : i64, scratch_operands = 1 : i64, tpu.core_type = #tpu.core_type<tc>, window_params = [{transform_indices = @transform_0, window_bounds = array<i64: 1, 4, 384>}, {pipeline_mode = #tpu.pipeline_mode<synchronous>, transform_indices = @transform_1, window_bounds = array<i64: 8, 36>}, {pipeline_mode = #tpu.pipeline_mode<synchronous>, transform_indices = @transform_2, window_bounds = array<i64: 8, 1>}, {transform_indices = @transform_3, window_bounds = array<i64: 1, 8, 240>}, {transform_indices = @transform_4, window_bounds = array<i64: 1, 8, 240>}, {transform_indices = @transform_5, window_bounds = array<i64: 1, 8, 256>}, {transform_indices = @transform_6, window_bounds = array<i64: 1, 8, 256>}]} {
    %c0 = arith.constant 0 : index
    %c0_0 = arith.constant 0 : index
    %0 = vector.load %arg3[%c0, %c0_0] : memref<8x1xf32, #tpu.memory_space<vmem>>, vector<8x1xf32>
    %c0_1 = arith.constant 0 : index
    %c0_2 = arith.constant 0 : index
    %c17 = arith.constant 17 : index
    %1 = vector.load %arg1[%c0_1, %c0_2, %c17] : memref<1x4x384xbf16, #tpu.memory_space<vmem>>, vector<1x4x240xbf16>
    %2 = vector.shape_cast %1 : vector<1x4x240xbf16> to vector<4x240xbf16>
    %c0_3 = arith.constant 0 : index
    %c0_4 = arith.constant 0 : index
    %3 = vector.load %arg8[%c0_3, %c0_4] : memref<16x256xbf16, #tpu.memory_space<vmem>>, vector<4x240xbf16>
    tpu.vector_store %arg8[%c0_3, %c0_4], %2 {strides = array<i32>} : memref<16x256xbf16, #tpu.memory_space<vmem>>, vector<4x240xbf16>,
    %c0_5 = arith.constant 0 : index
    %c0_6 = arith.constant 0 : index
    %c16 = arith.constant 16 : index
    %4 = vector.load %arg1[%c0_5, %c0_6, %c16] : memref<1x4x384xbf16, #tpu.memory_space<vmem>>, vector<1x4x240xbf16>
    %5 = vector.shape_cast %4 : vector<1x4x240xbf16> to vector<4x240xbf16>
    %c4 = arith.constant 4 : index
    %c0_7 = arith.constant 0 : index
    %6 = vector.load %arg8[%c4, %c0_7] : memref<16x256xbf16, #tpu.memory_space<vmem>>, vector<4x240xbf16>
    tpu.vector_store %arg8[%c4, %c0_7], %5 {strides = array<i32>} : memref<16x256xbf16, #tpu.memory_space<vmem>>, vector<4x240xbf16>,
    %c0_8 = arith.constant 0 : index
    %c0_9 = arith.constant 0 : index
    %c1 = arith.constant 1 : index
    %7 = vector.load %arg1[%c0_8, %c0_9, %c1] : memref<1x4x384xbf16, #tpu.memory_space<vmem>>, vector<1x4x240xbf16>
    %8 = vector.shape_cast %7 : vector<1x4x240xbf16> to vector<4x240xbf16>
    %c8 = arith.constant 8 : index
    %c0_10 = arith.constant 0 : index
    %9 = vector.load %arg8[%c8, %c0_10] : memref<16x256xbf16, #tpu.memory_space<vmem>>, vector<4x240xbf16>
    tpu.vector_store %arg8[%c8, %c0_10], %8 {strides = array<i32>} : memref<16x256xbf16, #tpu.memory_space<vmem>>, vector<4x240xbf16>,
    %c0_11 = arith.constant 0 : index
    %c0_12 = arith.constant 0 : index
    %c0_13 = arith.constant 0 : index
    %10 = vector.load %arg1[%c0_11, %c0_12, %c0_13] : memref<1x4x384xbf16, #tpu.memory_space<vmem>>, vector<1x4x240xbf16>
    %11 = vector.shape_cast %10 : vector<1x4x240xbf16> to vector<4x240xbf16>
    %c12 = arith.constant 12 : index
    %c0_14 = arith.constant 0 : index
    %12 = vector.load %arg8[%c12, %c0_14] : memref<16x256xbf16, #tpu.memory_space<vmem>>, vector<4x240xbf16>
    tpu.vector_store %arg8[%c12, %c0_14], %11 {strides = array<i32>} : memref<16x256xbf16, #tpu.memory_space<vmem>>, vector<4x240xbf16>,
    %c0_15 = arith.constant 0 : index
    %c0_16 = arith.constant 0 : index
    %13 = vector.load %arg2[%c0_15, %c0_16] : memref<8x36xbf16, #tpu.memory_space<vmem>>, vector<8x16xbf16>
    %c0_17 = arith.constant 0 : index
    %c0_18 = arith.constant 0 : index
    %14 = vector.load %arg8[%c0_17, %c0_18] : memref<16x256xbf16, #tpu.memory_space<vmem>>, vector<16x240xbf16>
    %cst = arith.constant dense<0.000000e+00> : vector<8x240xf32>
    %15 = tpu.matmul %13, %14, %cst {dimension_numbers = #tpu.dot_dimension_numbers<[1], [0], [0], [1], [0, 0, 1, 1], [], []>} : vector<8x16xbf16>, vector<16x240xbf16>, vector<8x240xf32> -> vector<8x240xf32>
    %16 = vector.broadcast %0 : vector<8x1xf32> to vector<8x240xf32>
    %17 = arith.addf %15, %16 : vector<8x240xf32>
    %c0_19 = arith.constant 0 : index
    %c0_20 = arith.constant 0 : index
    %c0_21 = arith.constant 0 : index
    %18 = vector.load %arg4[%c0_19, %c0_20, %c0_21] : memref<1x8x240xf32, #tpu.memory_space<vmem>>, vector<1x8x240xf32>
    %19 = vector.shape_cast %18 : vector<1x8x240xf32> to vector<8x240xf32>
    %20 = vector.shape_cast %17 : vector<8x240xf32> to vector<1x8x240xf32>
    tpu.vector_store %arg4[%c0_19, %c0_20, %c0_21], %20 {strides = array<i32>} : memref<1x8x240xf32, #tpu.memory_space<vmem>>, vector<1x8x240xf32>,
    %c0_22 = arith.constant 0 : index
    %c0_23 = arith.constant 0 : index
    %c16_24 = arith.constant 16 : index
    %21 = vector.load %arg1[%c0_22, %c0_23, %c16_24] : memref<1x4x384xbf16, #tpu.memory_space<vmem>>, vector<1x4x240xbf16>
    %22 = vector.shape_cast %21 : vector<1x4x240xbf16> to vector<4x240xbf16>
    %c0_25 = arith.constant 0 : index
    %c0_26 = arith.constant 0 : index
    %23 = vector.load %arg8[%c0_25, %c0_26] : memref<16x256xbf16, #tpu.memory_space<vmem>>, vector<4x240xbf16>
    tpu.vector_store %arg8[%c0_25, %c0_26], %22 {strides = array<i32>} : memref<16x256xbf16, #tpu.memory_space<vmem>>, vector<4x240xbf16>,
    %c0_27 = arith.constant 0 : index
    %c0_28 = arith.constant 0 : index
    %c0_29 = arith.constant 0 : index
    %24 = vector.load %arg1[%c0_27, %c0_28, %c0_29] : memref<1x4x384xbf16, #tpu.memory_space<vmem>>, vector<1x4x240xbf16>
    %25 = vector.shape_cast %24 : vector<1x4x240xbf16> to vector<4x240xbf16>
    %c4_30 = arith.constant 4 : index
    %c0_31 = arith.constant 0 : index
    %26 = vector.load %arg8[%c4_30, %c0_31] : memref<16x256xbf16, #tpu.memory_space<vmem>>, vector<4x240xbf16>
    tpu.vector_store %arg8[%c4_30, %c0_31], %25 {strides = array<i32>} : memref<16x256xbf16, #tpu.memory_space<vmem>>, vector<4x240xbf16>,
    %c0_32 = arith.constant 0 : index
    %c16_33 = arith.constant 16 : index
    %27 = vector.load %arg2[%c0_32, %c16_33] : memref<8x36xbf16, #tpu.memory_space<vmem>>, vector<8x8xbf16>
    %c0_34 = arith.constant 0 : index
    %c0_35 = arith.constant 0 : index
    %28 = vector.load %arg8[%c0_34, %c0_35] : memref<16x256xbf16, #tpu.memory_space<vmem>>, vector<8x240xbf16>
    %cst_36 = arith.constant dense<0.000000e+00> : vector<8x240xf32>
    %29 = tpu.matmul %27, %28, %cst_36 {dimension_numbers = #tpu.dot_dimension_numbers<[1], [0], [0], [1], [0, 0, 1, 1], [], []>} : vector<8x8xbf16>, vector<8x240xbf16>, vector<8x240xf32> -> vector<8x240xf32>
    %30 = vector.broadcast %0 : vector<8x1xf32> to vector<8x240xf32>
    %31 = arith.addf %29, %30 : vector<8x240xf32>
    %c0_37 = arith.constant 0 : index
    %c0_38 = arith.constant 0 : index
    %c0_39 = arith.constant 0 : index
    %32 = vector.load %arg5[%c0_37, %c0_38, %c0_39] : memref<1x8x240xf32, #tpu.memory_space<vmem>>, vector<1x8x240xf32>
    %33 = vector.shape_cast %32 : vector<1x8x240xf32> to vector<8x240xf32>
    %34 = vector.shape_cast %31 : vector<8x240xf32> to vector<1x8x240xf32>
    tpu.vector_store %arg5[%c0_37, %c0_38, %c0_39], %34 {strides = array<i32>} : memref<1x8x240xf32, #tpu.memory_space<vmem>>, vector<1x8x240xf32>,
    %c0_40 = arith.constant 0 : index
    %c0_41 = arith.constant 0 : index
    %c1_42 = arith.constant 1 : index
    %35 = vector.load %arg1[%c0_40, %c0_41, %c1_42] : memref<1x4x384xbf16, #tpu.memory_space<vmem>>, vector<1x4x256xbf16>
    %36 = vector.shape_cast %35 : vector<1x4x256xbf16> to vector<4x256xbf16>
    %c0_43 = arith.constant 0 : index
    %c0_44 = arith.constant 0 : index
    %37 = vector.load %arg8[%c0_43, %c0_44] : memref<16x256xbf16, #tpu.memory_space<vmem>>, vector<4x256xbf16>
    tpu.vector_store %arg8[%c0_43, %c0_44], %36 {strides = array<i32>} : memref<16x256xbf16, #tpu.memory_space<vmem>>, vector<4x256xbf16>,
    %c0_45 = arith.constant 0 : index
    %c0_46 = arith.constant 0 : index
    %c0_47 = arith.constant 0 : index
    %38 = vector.load %arg1[%c0_45, %c0_46, %c0_47] : memref<1x4x384xbf16, #tpu.memory_space<vmem>>, vector<1x4x256xbf16>
    %39 = vector.shape_cast %38 : vector<1x4x256xbf16> to vector<4x256xbf16>
    %c4_48 = arith.constant 4 : index
    %c0_49 = arith.constant 0 : index
    %40 = vector.load %arg8[%c4_48, %c0_49] : memref<16x256xbf16, #tpu.memory_space<vmem>>, vector<4x256xbf16>
    tpu.vector_store %arg8[%c4_48, %c0_49], %39 {strides = array<i32>} : memref<16x256xbf16, #tpu.memory_space<vmem>>, vector<4x256xbf16>,
    %c0_50 = arith.constant 0 : index
    %c24 = arith.constant 24 : index
    %41 = vector.load %arg2[%c0_50, %c24] : memref<8x36xbf16, #tpu.memory_space<vmem>>, vector<8x8xbf16>
    %c0_51 = arith.constant 0 : index
    %c0_52 = arith.constant 0 : index
    %42 = vector.load %arg8[%c0_51, %c0_52] : memref<16x256xbf16, #tpu.memory_space<vmem>>, vector<8x256xbf16>
    %cst_53 = arith.constant dense<0.000000e+00> : vector<8x256xf32>
    %43 = tpu.matmul %41, %42, %cst_53 {dimension_numbers = #tpu.dot_dimension_numbers<[1], [0], [0], [1], [0, 0, 1, 1], [], []>} : vector<8x8xbf16>, vector<8x256xbf16>, vector<8x256xf32> -> vector<8x256xf32>
    %44 = vector.broadcast %0 : vector<8x1xf32> to vector<8x256xf32>
    %45 = arith.addf %43, %44 : vector<8x256xf32>
    %c0_54 = arith.constant 0 : index
    %c0_55 = arith.constant 0 : index
    %c0_56 = arith.constant 0 : index
    %46 = vector.load %arg6[%c0_54, %c0_55, %c0_56] : memref<1x8x256xf32, #tpu.memory_space<vmem>>, vector<1x8x256xf32>
    %47 = vector.shape_cast %46 : vector<1x8x256xf32> to vector<8x256xf32>
    %48 = vector.shape_cast %45 : vector<8x256xf32> to vector<1x8x256xf32>
    tpu.vector_store %arg6[%c0_54, %c0_55, %c0_56], %48 {strides = array<i32>} : memref<1x8x256xf32, #tpu.memory_space<vmem>>, vector<1x8x256xf32>,
    %c0_57 = arith.constant 0 : index
    %c0_58 = arith.constant 0 : index
    %c0_59 = arith.constant 0 : index
    %49 = vector.load %arg1[%c0_57, %c0_58, %c0_59] : memref<1x4x384xbf16, #tpu.memory_space<vmem>>, vector<1x4x256xbf16>
    %50 = vector.shape_cast %49 : vector<1x4x256xbf16> to vector<4x256xbf16>
    %c0_60 = arith.constant 0 : index
    %c0_61 = arith.constant 0 : index
    %51 = vector.load %arg8[%c0_60, %c0_61] : memref<16x256xbf16, #tpu.memory_space<vmem>>, vector<4x256xbf16>
    tpu.vector_store %arg8[%c0_60, %c0_61], %50 {strides = array<i32>} : memref<16x256xbf16, #tpu.memory_space<vmem>>, vector<4x256xbf16>,
    %c0_62 = arith.constant 0 : index
    %c32 = arith.constant 32 : index
    %52 = vector.load %arg2[%c0_62, %c32] : memref<8x36xbf16, #tpu.memory_space<vmem>>, vector<8x4xbf16>
    %c0_63 = arith.constant 0 : index
    %c0_64 = arith.constant 0 : index
    %53 = vector.load %arg8[%c0_63, %c0_64] : memref<16x256xbf16, #tpu.memory_space<vmem>>, vector<4x256xbf16>
    %cst_65 = arith.constant dense<0.000000e+00> : vector<8x256xf32>
    %54 = tpu.matmul %52, %53, %cst_65 {dimension_numbers = #tpu.dot_dimension_numbers<[1], [0], [0], [1], [0, 0, 1, 1], [], []>} : vector<8x4xbf16>, vector<4x256xbf16>, vector<8x256xf32> -> vector<8x256xf32>
    %55 = vector.broadcast %0 : vector<8x1xf32> to vector<8x256xf32>
    %56 = arith.addf %54, %55 : vector<8x256xf32>
    %c0_66 = arith.constant 0 : index
    %c0_67 = arith.constant 0 : index
    %c0_68 = arith.constant 0 : index
    %57 = vector.load %arg7[%c0_66, %c0_67, %c0_68] : memref<1x8x256xf32, #tpu.memory_space<vmem>>, vector<1x8x256xf32>
    %58 = vector.shape_cast %57 : vector<1x8x256xf32> to vector<8x256xf32>
    %59 = vector.shape_cast %56 : vector<8x256xf32> to vector<1x8x256xf32>
    tpu.vector_store %arg7[%c0_66, %c0_67, %c0_68], %59 {strides = array<i32>} : memref<1x8x256xf32, #tpu.memory_space<vmem>>, vector<1x8x256xf32>,
    return
  }
  func.func @transform_0(%arg0: i32) -> (i32, i32, i32) {
    %c0_i32 = arith.constant 0 : i32
    %c0_i32_0 = arith.constant 0 : i32
    %c0_i32_1 = arith.constant 0 : i32
    return %arg0, %c0_i32, %c0_i32_0 : i32, i32, i32
  }
  func.func @transform_1(%arg0: i32) -> (i32, i32) {
    %c0_i32 = arith.constant 0 : i32
    %c0_i32_0 = arith.constant 0 : i32
    %c0_i32_1 = arith.constant 0 : i32
    return %c0_i32, %c0_i32_0 : i32, i32
  }
  func.func @transform_2(%arg0: i32) -> (i32, i32) {
    %c0_i32 = arith.constant 0 : i32
    %c0_i32_0 = arith.constant 0 : i32
    %c0_i32_1 = arith.constant 0 : i32
    return %c0_i32, %c0_i32_0 : i32, i32
  }
  func.func @transform_3(%arg0: i32) -> (i32, i32, i32) {
    %c0_i32 = arith.constant 0 : i32
    %c0_i32_0 = arith.constant 0 : i32
    %c0_i32_1 = arith.constant 0 : i32
    return %arg0, %c0_i32, %c0_i32_0 : i32, i32, i32
  }
  func.func @transform_4(%arg0: i32) -> (i32, i32, i32) {
    %c0_i32 = arith.constant 0 : i32
    %c0_i32_0 = arith.constant 0 : i32
    %c0_i32_1 = arith.constant 0 : i32
    return %arg0, %c0_i32, %c0_i32_0 : i32, i32, i32
  }
  func.func @transform_5(%arg0: i32) -> (i32, i32, i32) {
    %c0_i32 = arith.constant 0 : i32
    %c0_i32_0 = arith.constant 0 : i32
    %c0_i32_1 = arith.constant 0 : i32
    return %arg0, %c0_i32, %c0_i32_0 : i32, i32, i32
  }
  func.func @transform_6(%arg0: i32) -> (i32, i32, i32) {
    %c0_i32 = arith.constant 0 : i32
    %c0_i32_0 = arith.constant 0 : i32
    %c0_i32_1 = arith.constant 0 : i32
    return %arg0, %c0_i32, %c0_i32_0 : i32, i32, i32
  }
}

</mosaic_0001>

<bundles_post_ra>
// kernel: tpu_custom_call.1
= control target key start
LH: loop header
LB: loop body
LE: loop exit
PB: predicated region body
PF: predicated region fallthrough
CT: control target
= control target key end

     0   :  { %12 = vsyncpa [#allocation4], 0  ;;  %s1658_s0 = inlined_call_operand.hbm [shape: bf16[2,4,384], index: 0, kind: input, shape index: {}]   ;;  %s1659_s1 = inlined_call_operand.vmem [shape: bf16[8,36], index: 1, kind: input, shape index: {}]   ;;  %s1660_s2 = inlined_call_operand.vmem [shape: f32[8,1], index: 2, kind: input, shape index: {}]   ;;  %s1661_s3 = inlined_call_operand.hbm [shape: f32[2,8,240], index: 3, kind: output, shape index: {0}]   ;;  %s1662_s4 = inlined_call_operand.hbm [shape: f32[2,8,240], index: 4, kind: output, shape index: {1}]   ;;  %s1663_s5 = inlined_call_operand.hbm [shape: f32[2,8,256], index: 5, kind: output, shape index: {2}]   ;;  %s1664_s6 = inlined_call_operand.hbm [shape: f32[2,8,256], index: 6, kind: output, shape index: {3}]  }
   0x1   :  { %14 = vsyncpa [#allocation4 + $0x1], 0 }
   0x2   :  { %15 = vsyncpa [#allocation5], 0 }
   0x3   :  { %17 = vsyncpa [#allocation5 + $0x1], 0 }
   0x4   :  { %18 = vsyncpa [#allocation8], 0 }
   0x5   :  { %20 = vsyncpa [#allocation8 + $0x1], 0 }
   0x6   :  { %21 = vsyncpa [#allocation11], 0 }
   0x7   :  { %23 = vsyncpa [#allocation11 + $0x1], 0  ;;  %s1318_s21 = smov 0   ;;  %s1320_s22 = smov 0  }
   0x8   :  { %s1322_s23 = smov 0   ;;  %s1324_s24 = smov 0  }
   0x9 LB: > { %s1339_s25 = sadd.s32 4294967295, %s1269_s24   ;;  %s957_s26 = sadd.s32 4294967294, %s1269_s24   ;;  %s1269_s24 = sphi %s1324_s24, %s1678_s24   ;;  %s1265_s23 = sphi %s1322_s23, %s1677_s23   ;;  %s1261_s22 = sphi %s1320_s22, %s1676_s22   ;;  %s1257_s21 = sphi %s1318_s21, %s1675_s21  }
   0xa   : > { %s1343_s27 = sadd.s32 1, %s1269_s24   ;;  %s36_s28 = sadd.s32 1, %s1265_s23 }
   0xb   : > { %s33_s29 = ssub.s32 %s1269_s24, %s1343_s27  ;;  %p43_p0 = scmp.ne.s32.totalorder %s1265_s23, %s1261_s22 }
   0xc   : > { %p34_p1 = scmp.eq.s32.totalorder %s33_s29, 0  ;;  %p44_p2 = scmp.eq.s32.totalorder %s1269_s24, 0 }
   0xd   : > { %p49_p3 = scmp.ne.s32.totalorder %s1261_s22, %s1257_s21  ;;  %p50_p4 = scmp.eq.s32.totalorder %s1339_s25, 0 }
   0xe   : > { %s1355_s30 = scalar_select %p34_p1, %s1265_s23, %s36_s28  }
   0xf   : > { %p45_p5 = por %p44_p2, %p43_p0  ;;  %p1357_p6 = por %p50_p4, %p49_p3 }
  0x10   : > { %p115_p7 = scmp.eq.s32.totalorder %s1339_s25, 1  ;;  %p121_p8 = scmp.eq.s32.totalorder %s957_s26, 1 }
  0x11   : > { %p1029_p10 = scmp.lt.s32.totalorder %s1269_s24, 2  ;;  %s225_s10 = sand.u32 1, %s1265_s23  }
  0x12   : > { %p1366_p11 = por %p115_p7, %p43_p0  ;;  %p1370_p12 = por %p121_p8, %p49_p3 }
  0x13   : > { %s1000_s11 = smul.u32 96, %s1269_s24  ;;  %p1381_p13 = pnand %p1029_p10, %p45_p5 }
  0x14   : > { %s1667_s8 = scalar_select %p1366_p11, 1, 0 }
  0x15   : > { %s1668_s9 = scalar_select %p1370_p12, 1, 0 }
  0x16   : > { %s999_s12 = smul.u32 6, %s225_s10  ;;  %s1379_s15 = scalar_lea.hbm %s1658_s0, %s1000_s11 }
  0x17   : > { %s226_s19 = scalar_lea.sflag [#allocation4], %s225_s10  ;;  %s1081_s20 = scalar_lea.hbm %s1379_s15, 96 }
  0x18   : > { %s229_s17 = scalar_lea.vmem [#allocation3], %s999_s12  ;;  %p1082_p2 = scmp.ne.s32.totalorder %s1379_s15, %s1081_s20 }
  0x19   : > { %s237_s18 = sshll.u32 %s229_s17, 4  ;;  %p1083_p3 = pneg %p1381_p13  ;;  %s1386_s18 = int_to_ptr.vmem [resolvable:$true] %s237_s18 }
  0x1a   : > { %s1086_s11 = scalar_lea.hbm %s1658_s0, 192  ;;  %p1087_p7 = scmp.lt.u32.totalorder %s1379_s15, %s1658_s0 }
  0x1b   : > { %p1084_p4 = pnand %p1083_p3, %p1082_p2  ;;  %p1088_p8 = scmp.lt.u32.totalorder %s1086_s11, %s1081_s20 }
  0x1c   : > { %p1090_p9 = scmp.lt.u32.totalorder %s1081_s20, %s1379_s15 }
  0x1d   : > { %p1085_p5 = pneg %p1084_p4  ;;  %p1089_p10 = por %p1088_p8, %p1087_p7 }
  0x1f   : > { %p1091_p0 = por %p1090_p9, %p1089_p10 }
  0x21   : > { %p1092_p1 = pnand %p1091_p0, %p1085_p5 }
  0x23   : > { %1095 = shalt.err (!%p1092_p1)
}
  0x24   : > { %s1096_s10 = scalar_lea.vmem %s1386_s18, 96  ;;  %s1271_s12 = smov [#allocation3]  }
  0x25   : > { %p1097_p2 = scmp.ne.s32.totalorder %s1386_s18, %s1096_s10  ;;  %s1101_s17 = sshll.u32 %s1271_s12, 4  ;;  %s1102_s17 = int_to_ptr.vmem [resolvable:$false] %s1101_s17 }
  0x26   : > { %s1103_s28 = scalar_lea.vmem %s1102_s17, 192  ;;  %p1104_p11 = scmp.lt.s32.totalorder %s1386_s18, %s1102_s17 }
  0x27   : > { %p1099_p4 = pnand %p1097_p2, %p1083_p3  ;;  %p1105_p7 = scmp.lt.s32.totalorder %s1103_s28, %s1096_s10 }
  0x29   : > { %p1100_p12 = pneg %p1099_p4  ;;  %p1106_p8 = por %p1105_p7, %p1104_p11 }
  0x2b   : > { %p1107_p9 = pnand %p1106_p8, %p1100_p12 }
  0x2d   : > { %1110 = shalt.err (!%p1107_p9)
}
  0x2e   : > { %1015 = dma.hbm_to_vmem [thread:$0]  (!%p1381_p13), %s1379_s15, 96, %s1386_s18, %s226_s19  }
  0x2f   : > { %p1670_p0 = scmp.lt.s32.totalorder %s1269_s24, 3  ;;  %p1671_p1 = scmp.ge.s32.totalorder %s1269_s24, 1 }
  0x31   : > { %p243_p3 = pnand %p1671_p1, %p1670_p0 }
  0x32   : > { %s1419_s20 = sand.u32 (!%p243_p3), 1, %s1261_s22  }
  0x33   : > { %246 = sbr.rel (%p243_p3) target bundleno = 509 (0x1fd), region = 32  ;;  %s249_s11 = scalar_lea.sflag (!%p243_p3), [#allocation4], %s1419_s20 }
  0x34   : > { %s1001_s29 = smul.u32 (!%p243_p3), 6, %s1419_s20 }
  0x36   : > { %s1423_s13 = scalar_lea.vmem (!%p243_p3), [#allocation3], %s1001_s29 }
  0x3a   : > { %1240 = dma.done.wait (%p1357_p6), %s249_s11, 96  }
  0x3b   : > { %1242 = vsyncadd (%p1357_p6), %s249_s11, 4294967200  ;;  %v304_v0 = vlaneseq  ;;  %v1272_v1 = vmov 1983009808   ;;  %v298_v6 = vld [vmem:[%s1423_s13] sm:$0x3f]  ;;  %s1273_s15 = smov 111  }
  0x3c   : > { %v302_v2 = vunpack.c.l.s4 %v1272_v1  ;;  %v1073_v7 = vld [vmem:[%s1423_s13] ss:$0 sps:$4 sm:$0xff]   ;;  %v300_v9 = vcombine.high %v298_v6, %v298_v6  ;;  %vm387_vm0 = vcmask 916486   ;;  %s1274_s7 = smov 112   ;;  %s1275_s16 = smov 127   ;;  %v1276_v25 = vmov 0  }
  0x3d   : > { %v305_v3 = vshrl.u32 %v304_v0, 7  ;;  %v1078_v13 = vld [vmem:[%s1423_s13] ss:$0 sps:$4 sm:$0xff]   ;;  %433 = vmatprep.mubr.bf16.mxu0 %v1276_v25  ;;  %530 = vmatprep.mubr.bf16.mxu1 %v1276_v25  ;;  %v1075_v26 = vld [vmem:[%s1659_s1] ss:$0 sps:$4 sm:$0xff]   ;;  %s1277_s28 = smov 104  }
  0x3e   : > { %v303_v4 = vunpack.c.0.s8 %v302_v2  ;;  %v1438_v14 = vld.sshfl [vmem:[%s1423_s13] sm:$0x33 pattern:$0x76325410]  ;;  %1070 = vset.pattern.permute.xlu1 %v1276_v25  ;;  %1071 = vset.pattern.permute.xlu0 %v1276_v25  ;;  %v1077_v27 = vld [vmem:[%s1659_s1] ss:$0 sps:$4 sm:$0xff]  }
  0x3f   : > { %v361_v18 = vcombine.low %v1438_v14, %v1438_v14  ;;  %v541_v19 = vld [vmem:[%s1423_s13] sm:$0x3f]  ;;  %v1447_v20 = vcombine.high %v1438_v14, %v1438_v14  ;;  %v1076_v28 = vld [vmem:[%s1659_s1] ss:$0 sps:$4 sm:$0xff]   ;;  %s1278_s29 = smov 96   ;;  %vm322_vm1 = vcmask 908288  }
  0x40   : > { %v1429_v5 = vsub.s32 %v303_v4, %v305_v3  ;;  %v543_v22 = vcombine.high %v541_v19, %v541_v19  ;;  %v297_v29 = vld [vmem:[%s1660_s2] sm:$0xff]  ;;  %vm328_vm2 = vcmask 910336   ;;  %vm350_vm3 = vcmask 912386   ;;  %v1079_v38 = vld [vmem:[%s1423_s13] ss:$0 sps:$4 sm:$0xff]   ;;  %s1499_s18 = sshll.u32 %s1339_s25, 8 }
  0x41   : > { %vm345_vm4 = vcmask 916480   ;;  %vm371_vm5 = vcmask 914436   ;;  %vm366_vm6 = vcmask 1039360   ;;  %v1080_v46 = vld [vmem:[%s1423_s13] ss:$0 sps:$4 sm:$0xff]   ;;  %vm397_vm7 = vcmask 130048   ;;  %s1508_s17 = scalar_lea.hbm %s1661_s3, %s1499_s18 }
  0x42   : > { %v307_v8 = vrot.slane %v298_v6, %v1429_v5  ;;  %v314_v11 = vrot.slane %v300_v9, %v1429_v5  ;;  %v339_v12 = vrot.slane %v1073_v7, %v1429_v5  ;;  %v382_v15 = vrot.slane %v1078_v13, %v1429_v5  ;;  %v389_v52 = vld [vmem:[%s1659_s1] sm:$0xf]  ;;  %s1494_s13 = sshll.u32 %s1419_s20, 4  ;;  %p1672_p11 = scmp.ne.s32.totalorder %s1667_s8, 0 }
  0x43   : > { %v550_v21 = vrot.slane %v541_v19, %v1429_v5  ;;  %v557_v24 = vrot.slane %v543_v22, %v1429_v5  ;;  %v473_v42 = vrot.slane %v1079_v38, %v1429_v5  ;;  %v580_v51 = vrot.slane %v1080_v46, %v1429_v5  ;;  %s274_s19 = scalar_lea.vmem [#allocation6], %s1494_s13  ;;  %s1279_s11 = smov [#allocation6]  }
  0x44   : > { %316 = vrot.lane.b32.xlu0 %v307_v8, %s1273_s15  ;;  %v315_v10 = vcombine.high %v307_v8, %v307_v8  ;;  %320 = vrot.lane.b32.xlu1 %v314_v11, %s1273_s15  ;;  %v340_v16 = vcombine.high %v339_v12, %v339_v12  ;;  %388 = vst.msk [vmem:[#allocation2 + $0x8] sm:$0xc0] %vm387_vm0, %v382_v15  ;;  %vm491_vm8 = vcmask 1043456   ;;  %vm487_vm9 = vcmask 64512   ;;  %s752_s14 = sshll.u32 %s274_s19, 4  ;;  %s1510_s14 = int_to_ptr.vmem [resolvable:$true] %s752_s14 }
  0x45   : > { %v383_v17 = vcombine.low %v382_v15, %v382_v15  ;;  %v558_v23 = vcombine.high %v550_v21, %v550_v21  ;;  %v474_v45 = vcombine.high %v473_v42, %v473_v42  ;;  %v581_v55 = vcombine.high %v580_v51, %v580_v51 }
  0x46   : > { %vm672_vm10 = vcmask 1041408   ;;  %vm668_vm11 = vcmask 31744  }
  0x47   : > { %386 = vst [vmem:[#allocation2] sm:$0xc0] %v383_v17 }
  0x48   : > { %318 = vrot.lane.b32.xlu0 %v315_v10, %s1273_s15  ;;  %341 = vrot.lane.b32.xlu1 %v339_v12, %s1274_s7  ;;  %s1115_s15 = sshll.u32 %s1279_s11, 4  ;;  %s1116_s15 = int_to_ptr.vmem [resolvable:$false] %s1115_s15 }
  0x49   : > { %p1118_p5 = scmp.lt.s32.totalorder %s1510_s14, %s1116_s15 }
  0x4c   : > { %343 = vrot.lane.b32.xlu0 %v340_v16, %s1274_s7  ;;  %362 = vrot.lane.b32.xlu1 %v361_v18, %s1275_s16 }
  0x50   : > { %364 = vrot.lane.b32.xlu0 %v1438_v14, %s1275_s16  ;;  %455 = vrot.lane.b32.xlu1 %v1438_v14, %s1274_s7 }
  0x54   : > { %457 = vrot.lane.b32.xlu0 %v1447_v20, %s1274_s7  ;;  %559 = vrot.lane.b32.xlu1 %v550_v21, %s1275_s16 }
  0x58   : > { %561 = vrot.lane.b32.xlu0 %v558_v23, %s1275_s16  ;;  %563 = vrot.lane.b32.xlu1 %v557_v24, %s1275_s16 }
  0x5c   : > { %485 = vrot.lane.b32.xlu0 %v1075_v26, %s1274_s7  ;;  %592 = vrot.lane.b32.xlu1 %v1077_v27, %s1277_s28  ;;  %s723_s28 = scalar_lea.sflag [#allocation5], %s1419_s20  ;;  %s1117_s7 = scalar_lea.vmem %s1116_s15, 512 }
  0x60   : > { %666 = vrot.lane.b32.xlu0 %v1076_v28, %s1278_s29  ;;  %394 = vperm.xlu1 %1070, %v297_v29   ;;  %s1111_s29 = scalar_lea.vmem %s1510_s14, 256 }
  0x61   : > { %p1112_p6 = scmp.ne.s32.totalorder %s1510_s14, %s1111_s29  ;;  %p1119_p10 = scmp.lt.s32.totalorder %s1117_s7, %s1111_s29 }
  0x63   : > { %p1113_p12 = pnand %p1112_p6, %p1672_p11  ;;  %p1120_p2 = por %p1119_p10, %p1118_p5 }
  0x65   : > { %p1114_p13 = pneg %p1113_p12 }
  0x67   : > { %p1121_p4 = pnand %p1120_p2, %p1114_p13 }
  0xb6   : > { %v317_v30 = vpop.permute.xlu0 %316  ;;  %v321_v31 = vpop.permute.xlu1 %320 }
  0xba   : > { %v319_v32 = vpop.permute.xlu0 %318  ;;  %v342_v35 = vpop.permute.xlu1 %341 }
  0xbb   : > { %v323_v33 = vsel %vm322_vm1, %v317_v30, %v319_v32  ;;  %v324_v34 = vsel %vm322_vm1, %v319_v32, %v321_v31 }
  0xbc   : > { %327 = vst [vmem:[#allocation2] sm:$0x3] %v323_v33  ;;  %329 = vst.msk [vmem:[#allocation2 + $0x8] sm:$0x3] %vm328_vm2, %v324_v34 }
  0xbe   : > { %v344_v36 = vpop.permute.xlu0 %343  ;;  %v363_v39 = vpop.permute.xlu1 %362 }
  0xbf   : > { %351 = vst.msk [vmem:[#allocation2 + $0x8] sm:$0xc] %vm350_vm3, %v344_v36  ;;  %v346_v37 = vsel %vm345_vm4, %v342_v35, %v344_v36 }
  0xc0   : > { %349 = vst [vmem:[#allocation2] sm:$0xc] %v346_v37 }
  0xc2   : > { %v365_v40 = vpop.permute.xlu0 %364  ;;  %v456_v43 = vpop.permute.xlu1 %455 }
  0xc3   : > { %372 = vst.msk [vmem:[#allocation2 + $0x8] sm:$0x30] %vm371_vm5, %v365_v40  ;;  %v367_v41 = vsel %vm366_vm6, %v363_v39, %v365_v40 }
  0xc4   : > { %370 = vst [vmem:[#allocation2] sm:$0x30] %v367_v41 }
  0xc6   : > { %v458_v44 = vpop.permute.xlu0 %457  ;;  %v560_v47 = vpop.permute.xlu1 %559 }
  0xc7   : > { %v459_v48 = vsel %vm345_vm4, %v456_v43, %v458_v44 }
  0xca   : > { %v391_v49 = vld [vmem:[#allocation2 + $0x8] sm:$0xff]  ;;  %v564_v53 = vpop.permute.xlu1 %563  ;;  %v562_v54 = vpop.permute.xlu0 %561 }
  0xcb   : > { %463 = vst.msk [vmem:[#allocation2 + $0x8] sm:$0x3] %vm328_vm2, %v458_v44  ;;  %v390_v50 = vld [vmem:[#allocation2] sm:$0xff]  ;;  %401 = vmatprep.subr.bf16.mxu0 %v391_v49  ;;  %v566_v56 = vsel %vm366_vm6, %v562_v54, %v564_v53  ;;  %v565_v58 = vsel %vm366_vm6, %v560_v47, %v562_v54 }
  0xcc   : > { %478 = vst.msk [vmem:[#allocation2 + $0x8] sm:$0xc] %vm350_vm3, %v474_v45  ;;  %462 = vst [vmem:[#allocation2] sm:$0x3] %v459_v48  ;;  %402 = vmatpush1.bf16.msra.mxu0 %v390_v50 }
  0xcd   : > { %969 = vst.sshfl [vmem:[#allocation2] sm:$0x30 pattern:$0x76325410] %v1079_v38 }
  0xce   : > { %v486_v61 = vpop.permute.xlu0 %485  ;;  %v593_v1 = vpop.permute.xlu1 %592 }
  0xcf   : > { %967 = vmatmul.mubr.msk.bf16.vlgmr.msra.gmra.mrb[0].mxu0 %vm397_vm7, %v389_v52 }
  0xd0   : > { %635 = vmatprep.mubr.bf16.mxu0 %v1276_v25 }
  0xd2   : > { %v667_v5 = vpop.permute.xlu0 %666 }
  0xd3   : > { %v481_v57 = vld [vmem:[#allocation2 + $0x8] sm:$0xf] }
  0xd4   : > { %971 = vmatprep.subr.msk.bf16.mxu1 %vm491_vm8, %v481_v57  ;;  %570 = vst [vmem:[#allocation2 + $0x8] sm:$0x3] %v566_v56  ;;  %585 = vst [vmem:[#allocation2 + $0x8] sm:$0xc] %v581_v55  ;;  %v480_v59 = vld [vmem:[#allocation2] sm:$0xf] }
  0xd5   : > { %v493_v60 = vsel %vm491_vm8, %v480_v59, 0  ;;  %569 = vst [vmem:[#allocation2] sm:$0x3] %v565_v58 }
  0xd6   : > { %973 = vst.sshfl [vmem:[#allocation2] sm:$0x30 pattern:$0x76325410] %v1080_v46  ;;  %499 = vmatpush1.bf16.msra.mxu1 %v493_v60 }
  0xd9   : > { %972 = vmatmul.mubr.msk.bf16.vlgmr.msra.gmra.mrb[0].mxu1 %vm487_vm9, %v486_v61 }
  0xda   : > { %711 = vmatprep.mubr.bf16.mxu1 %v1276_v25 }
  0xdb   : > { %v588_v62 = vld [vmem:[#allocation2 + $0x8] sm:$0xf] }
  0xdc   : > { %975 = vmatprep.subr.msk.bf16.mxu0 %vm491_vm8, %v588_v62  ;;  %659 = vst [vmem:[#allocation2 + $0x8] sm:$0x3] %v1447_v20 }
  0xdd   : > { %v587_v63 = vld [vmem:[#allocation2] sm:$0xf] }
  0xde   : > { %v598_v0 = vsel %vm491_vm8, %v587_v63, 0  ;;  %658 = vst [vmem:[#allocation2] sm:$0x3] %v1438_v14 }
  0xdf   : > { %604 = vmatpush1.bf16.msra.mxu0 %v598_v0  ;;  %v1496_v6 = vpop.permute.xlu1 %394 }
  0xe2   : > { %976 = vmatmul.mubr.msk.bf16.vlgmr.msra.gmra.mrb[4].mxu0 %vm487_vm9, %v593_v1 }
  0xe3   : > { %v662_v2 = vld [vmem:[#allocation2 + $0x8] sm:$0x3] }
  0xe4   : > { %979 = vmatprep.subr.msk.bf16.mxu1 %vm672_vm10, %v662_v2 }
  0xe5   : > { %v661_v3 = vld [vmem:[#allocation2] sm:$0x3] }
  0xe6   : > { %v674_v4 = vsel %vm672_vm10, %v661_v3, 0 }
  0xe7   : > { %680 = vmatpush1.bf16.msra.mxu1 %v674_v4 }
  0xea   : > { %980 = vmatmul.mubr.msk.bf16.vlgmr.msra.gmra.mrb[4].mxu1 %vm668_vm11, %v667_v5 }
 0x1a2   : > { %v435_v7 = vpop.f32.mrb[0].mxu0 }
 0x1a3   : > { %v437_v8 = vpop.f32.mrb[1].mxu0  ;;  %v436_v9 = vadd.f32 %v435_v7, %v1496_v6 }
 0x1a4   : > { %v439_v10 = vpop.f32.mrb[2].mxu0  ;;  %v438_v11 = vadd.f32 %v437_v8, %v1496_v6 }
 0x1a5   : > { %v440_v12 = vpop.f32.mrb[3].mxu0  ;;  %442 = vst [vmem:[%s274_s19] sm:$0xff] %v436_v9 }
 0x1a6   : > { %444 = vst.msk [vmem:[%s274_s19 + $0x8] sm:$0xff] %vm345_vm4, %v438_v11 }
 0x1a7   : > { %1124 = shalt.err (!%p1121_p4)
}
 0x1a8   : > { %s1125_s16 = scalar_lea.hbm %s1508_s17, 256  ;;  %s1129_s12 = scalar_lea.hbm %s1661_s3, 512 }
 0x1a9   : > { %p1126_p7 = scmp.ne.s32.totalorder %s1508_s17, %s1125_s16  ;;  %p1130_p0 = scmp.lt.u32.totalorder %s1508_s17, %s1661_s3 }
 0x1aa   : > { %p1131_p1 = scmp.lt.u32.totalorder %s1129_s12, %s1125_s16  ;;  %p1133_p6 = scmp.lt.u32.totalorder %s1125_s16, %s1508_s17 }
 0x1ab   : > { %p1127_p8 = pnand %p1126_p7, %p1672_p11 }
 0x1ac   : > { %p1132_p3 = por %p1131_p1, %p1130_p0 }
 0x1ad   : > { %p1128_p9 = pneg %p1127_p8 }
 0x1ae   : > { %p1134_p12 = por %p1133_p6, %p1132_p3 }
 0x1b0   : > { %p1135_p13 = pnand %p1134_p12, %p1128_p9 }
 0x1b2   : > { %1138 = shalt.err (!%p1135_p13)
}
 0x1b3   : > { %1004 = dma.vmem_to_hbm [thread:$0]  (%p1672_p11), %s1510_s14, 256, %s1508_s17, %s723_s28   ;;  %v532_v13 = vpop.f32.mrb[0].mxu1 }
 0x1b4   : > { %s727_s29 = sand.u32 1, %s1339_s25   ;;  %s281_s7 = scalar_lea.vmem [#allocation7], %s1494_s13  ;;  %v534_v14 = vpop.f32.mrb[1].mxu1  ;;  %v533_v15 = vadd.f32 %v532_v13, %v1496_v6 }
 0x1b5   : > { %s766_s19 = sshll.u32 %s281_s7, 4  ;;  %v536_v16 = vpop.f32.mrb[2].mxu1  ;;  %v535_v17 = vadd.f32 %v534_v14, %v1496_v6  ;;  %s1543_s12 = scalar_lea.hbm %s1662_s4, %s1499_s18  ;;  %s1545_s19 = int_to_ptr.vmem [resolvable:$true] %s766_s19 }
 0x1b6   : > { %v537_v18 = vpop.f32.mrb[3].mxu1  ;;  %539 = vst [vmem:[%s281_s7] sm:$0xff] %v533_v15  ;;  %s1548_s25 = scalar_lea.sflag [#allocation8], %s727_s29  ;;  %s1139_s14 = scalar_lea.vmem %s1545_s19, 256 }
 0x1b7   : > { %540 = vst.msk [vmem:[%s281_s7 + $0x8] sm:$0xff] %vm345_vm4, %v535_v17  ;;  %p1140_p5 = scmp.ne.s32.totalorder %s1545_s19, %s1139_s14  ;;  %s1280_s17 = smov [#allocation7]  }
 0x1b8   : > { %s1143_s28 = sshll.u32 %s1280_s17, 4  ;;  %s1144_s28 = int_to_ptr.vmem [resolvable:$false] %s1143_s28 }
 0x1b9   : > { %p1141_p10 = pnand %p1140_p5, %p1672_p11  ;;  %s1145_s11 = scalar_lea.vmem %s1144_s28, 512 }
 0x1ba   : > { %p1146_p4 = scmp.lt.s32.totalorder %s1545_s19, %s1144_s28  ;;  %p1147_p7 = scmp.lt.s32.totalorder %s1145_s11, %s1139_s14 }
 0x1bb   : > { %p1142_p2 = pneg %p1141_p10 }
 0x1bc   : > { %p1148_p8 = por %p1147_p7, %p1146_p4 }
 0x1be   : > { %p1149_p9 = pnand %p1148_p8, %p1142_p2 }
 0x1c0   : > { %1152 = shalt.err (!%p1149_p9)
}
 0x1c1   : > { %s1153_s15 = scalar_lea.hbm %s1543_s12, 256  ;;  %s1157_s16 = scalar_lea.hbm %s1662_s4, 512 }
 0x1c2   : > { %p1154_p0 = scmp.ne.s32.totalorder %s1543_s12, %s1153_s15  ;;  %p1158_p6 = scmp.lt.u32.totalorder %s1543_s12, %s1662_s4 }
 0x1c3   : > { %p1159_p12 = scmp.lt.u32.totalorder %s1157_s16, %s1153_s15  ;;  %p1161_p5 = scmp.lt.u32.totalorder %s1153_s15, %s1543_s12 }
 0x1c4   : > { %p1155_p1 = pnand %p1154_p0, %p1672_p11 }
 0x1c5   : > { %p1160_p13 = por %p1159_p12, %p1158_p6 }
 0x1c6   : > { %p1156_p3 = pneg %p1155_p1 }
 0x1c7   : > { %p1162_p10 = por %p1161_p5, %p1160_p13 }
 0x1c9   : > { %p1163_p2 = pnand %p1162_p10, %p1156_p3 }
 0x1cb   : > { %1166 = shalt.err (!%p1163_p2)
}
 0x1cc   : > { %1005 = dma.vmem_to_hbm [thread:$0]  (%p1672_p11), %s1545_s19, 256, %s1543_s12, %s1548_s25   ;;  %v637_v19 = vpop.f32.mrb[4].mxu0 }
 0x1cd   : > { %s288_s14 = scalar_lea.vmem [#allocation9], %s1494_s13  ;;  %v638_v20 = vadd.f32 %v637_v19, %v1496_v6  ;;  %v639_v21 = vpop.f32.mrb[5].mxu0  ;;  %s1581_s29 = scalar_lea.hbm %s1663_s5, %s1499_s18 }
 0x1ce   : > { %s780_s28 = sshll.u32 %s288_s14, 4  ;;  %v640_v22 = vadd.f32 %v639_v21, %v1496_v6  ;;  %v641_v23 = vpop.f32.mrb[6].mxu0  ;;  %s1281_s12 = smov [#allocation9]   ;;  %s1574_s28 = int_to_ptr.vmem [resolvable:$true] %s780_s28 }
 0x1cf   : > { %644 = vst [vmem:[%s288_s14] sm:$0xff] %v638_v20  ;;  %v642_v24 = vpop.f32.mrb[7].mxu0  ;;  %s1167_s19 = scalar_lea.vmem %s1574_s28, 256  ;;  %s1171_s7 = sshll.u32 %s1281_s12, 4  ;;  %s1172_s7 = int_to_ptr.vmem [resolvable:$false] %s1171_s7 }
 0x1d0   : > { %645 = vst [vmem:[%s288_s14 + $0x8] sm:$0xff] %v640_v22  ;;  %p1168_p4 = scmp.ne.s32.totalorder %s1574_s28, %s1167_s19  ;;  %s1173_s16 = scalar_lea.vmem %s1172_s7, 512 }
 0x1d1   : > { %p1174_p9 = scmp.lt.s32.totalorder %s1574_s28, %s1172_s7  ;;  %p1175_p0 = scmp.lt.s32.totalorder %s1173_s16, %s1167_s19 }
 0x1d2   : > { %p1169_p7 = pnand %p1168_p4, %p1672_p11 }
 0x1d3   : > { %p1176_p1 = por %p1175_p0, %p1174_p9 }
 0x1d4   : > { %p1170_p8 = pneg %p1169_p7 }
 0x1d6   : > { %p1177_p3 = pnand %p1176_p1, %p1170_p8 }
 0x1d8   : > { %1180 = shalt.err (!%p1177_p3)
}
 0x1d9   : > { %s1181_s10 = scalar_lea.hbm %s1581_s29, 256  ;;  %s1185_s11 = scalar_lea.hbm %s1663_s5, 512 }
 0x1da   : > { %p1182_p6 = scmp.ne.s32.totalorder %s1581_s29, %s1181_s10  ;;  %p1186_p5 = scmp.lt.u32.totalorder %s1581_s29, %s1663_s5 }
 0x1db   : > { %p1187_p10 = scmp.lt.u32.totalorder %s1185_s11, %s1181_s10  ;;  %p1189_p4 = scmp.lt.u32.totalorder %s1181_s10, %s1581_s29 }
 0x1dc   : > { %p1183_p12 = pnand %p1182_p6, %p1672_p11 }
 0x1dd   : > { %p1188_p2 = por %p1187_p10, %p1186_p5 }
 0x1de   : > { %p1184_p13 = pneg %p1183_p12 }
 0x1df   : > { %p1190_p7 = por %p1189_p4, %p1188_p2 }
 0x1e1   : > { %p1191_p8 = pnand %p1190_p7, %p1184_p13 }
 0x1e3   : > { %1194 = shalt.err (!%p1191_p8)
}
 0x1e4   : > { %1006 = dma.vmem_to_hbm [thread:$0]  (%p1672_p11), %s1574_s28, 256, %s1581_s29, %s1548_s25   ;;  %v713_v25 = vpop.f32.mrb[4].mxu1 }
 0x1e5   : > { %s295_s19 = scalar_lea.vmem [#allocation10], %s1494_s13  ;;  %v714_v26 = vadd.f32 %v713_v25, %v1496_v6  ;;  %v715_v27 = vpop.f32.mrb[5].mxu1  ;;  %s1612_s17 = scalar_lea.hbm %s1664_s6, %s1499_s18 }
 0x1e6   : > { %s794_s7 = sshll.u32 %s295_s19, 4  ;;  %v716_v28 = vadd.f32 %v715_v27, %v1496_v6  ;;  %v717_v29 = vpop.f32.mrb[6].mxu1  ;;  %s738_s13 = scalar_lea.sflag [#allocation11], %s1419_s20  ;;  %s1614_s7 = int_to_ptr.vmem [resolvable:$true] %s794_s7 }
 0x1e7   : > { %720 = vst [vmem:[%s295_s19] sm:$0xff] %v714_v26  ;;  %v718_v30 = vpop.f32.mrb[7].mxu1  ;;  %s1195_s25 = scalar_lea.vmem %s1614_s7, 256  ;;  %s1282_s28 = smov [#allocation10]  }
 0x1e8   : > { %721 = vst [vmem:[%s295_s19 + $0x8] sm:$0xff] %v716_v28  ;;  %p1196_p9 = scmp.ne.s32.totalorder %s1614_s7, %s1195_s25  ;;  %s1199_s29 = sshll.u32 %s1282_s28, 4  ;;  %s1200_s29 = int_to_ptr.vmem [resolvable:$false] %s1199_s29 }
 0x1e9   : > { %s1201_s14 = scalar_lea.vmem %s1200_s29, 512  ;;  %p1202_p3 = scmp.lt.s32.totalorder %s1614_s7, %s1200_s29 }
 0x1ea   : > { %p1197_p0 = pnand %p1196_p9, %p1672_p11  ;;  %p1203_p6 = scmp.lt.s32.totalorder %s1201_s14, %s1195_s25 }
 0x1ec   : > { %p1198_p1 = pneg %p1197_p0  ;;  %p1204_p12 = por %p1203_p6, %p1202_p3 }
 0x1ee   : > { %p1205_p13 = pnand %p1204_p12, %p1198_p1 }
 0x1f0   : > { %1208 = shalt.err (!%p1205_p13)
}
 0x1f1   : > { %s1209_s20 = scalar_lea.hbm %s1612_s17, 256  ;;  %s1213_s15 = scalar_lea.hbm %s1664_s6, 512 }
 0x1f2   : > { %p1210_p5 = scmp.ne.s32.totalorder %s1612_s17, %s1209_s20  ;;  %p1214_p4 = scmp.lt.u32.totalorder %s1612_s17, %s1664_s6 }
 0x1f3   : > { %p1215_p7 = scmp.lt.u32.totalorder %s1213_s15, %s1209_s20  ;;  %p1217_p9 = scmp.lt.u32.totalorder %s1209_s20, %s1612_s17 }
 0x1f4   : > { %p1211_p10 = pnand %p1210_p5, %p1672_p11 }
 0x1f5   : > { %p1216_p8 = por %p1215_p7, %p1214_p4 }
 0x1f6   : > { %p1212_p2 = pneg %p1211_p10 }
 0x1f7   : > { %p1218_p0 = por %p1217_p9, %p1216_p8 }
 0x1f9   : > { %p1219_p1 = pnand %p1218_p0, %p1212_p2 }
 0x1fb   : > { %1222 = shalt.err (!%p1219_p1)
}
 0x1fc   : > { %1007 = dma.vmem_to_hbm [thread:$0]  (%p1672_p11), %s1614_s7, 256, %s1612_s17, %s738_s13  }
 0x1fd PF: > { %s806_s16 = sand.u32 1, %s1257_s21   ;;  %p1673_p3 = scmp.ne.s32.totalorder %s1668_s9, 0 }
 0x1fe   : > { %p1674_p6 = scmp.ge.s32.totalorder %s1269_s24, 2  ;;  %s807_s10 = scalar_lea.sflag [#allocation5], %s806_s16 }
 0x200   : > { %p1017_p12 = pnand %p1674_p6, %p1673_p3 }
 0x202   : > { %1244 = dma.done.wait (!%p1017_p12), %s807_s10, 256  }
 0x203   : > { %1246 = vsyncadd (!%p1017_p12), %s807_s10, 4294967040  ;;  %s815_s25 = sand.u32 1, %s957_s26  }
 0x204   : > { %s816_s28 = scalar_lea.sflag [#allocation8], %s815_s25 }
 0x205   : > { %1248 = dma.done.wait (!%p1017_p12), %s816_s28, 512  }
 0x206   : > { %1250 = vsyncadd (!%p1017_p12), %s816_s28, 4294966784  ;;  %s834_s8 = scalar_lea.sflag [#allocation11], %s806_s16 }
 0x207   : > { %1252 = dma.done.wait (!%p1017_p12), %s834_s8, 256  }
 0x208   : > { %1254 = vsyncadd (!%p1017_p12), %s834_s8, 4294967040  ;;  %p26_p11 = scmp.ge.s32.totalorder %s1343_s27, 4   ;;  %s1675_s21 = smov %s1261_s22 }
 0x209   : > { %s1676_s22 = smov %s1265_s23  ;;  %s1677_s23 = smov %s1355_s30 }
 0x20a   : > { %s1678_s24 = smov %s1343_s27  ;;  %28 = sbr.rel (!%p26_p11) target bundleno = 9 (0x9), region = 126 }
 0x211   :  { %839 = vsyncpa [#allocation4], 1 }
 0x212   :  { %841 = vsyncpa [#allocation4 + $0x1], 1 }
 0x213   :  { %842 = vsyncpa [#allocation5], 1 }
 0x214   :  { %844 = vsyncpa [#allocation5 + $0x1], 1 }
 0x215   :  { %845 = vsyncpa [#allocation8], 1 }
 0x216   :  { %847 = vsyncpa [#allocation8 + $0x1], 1 }
 0x217   :  { %848 = vsyncpa [#allocation11], 1 }
 0x218   :  { %850 = vsyncpa [#allocation11 + $0x1], 1 }

</bundles_post_ra>
